<compile_context>
chip_gen: v5e
topology: v5e:2x2
jax: 0.10.0
libtpu: 0.0.40
codegen_flags: <defaults>
</compile_context>

<pallas_src>
import functools

import jax
import jax.numpy as jnp
from jax.experimental import pallas as pl
from jax.experimental.pallas import tpu as pltpu


def _fp_kernel(n_rest, mm_dtype, idx_bits, *refs):
    (u_ref, k_ref, uf_ref, g_ref, w0s_ref, b0_ref) = refs[:6]
    o_ref = refs[-1]
    rest = refs[6:-1]

    u = u_ref[0]        # (3, TN)   unknown coords, points on lanes
    k = k_ref[0]        # (m, 3)    known coords
    uf = uf_ref[0]      # (C1, TN)  skip features
    g = g_ref[0]        # (c0, m)   W0[:, :C2] @ known_feats (folded layer 0)

    m = k.shape[0]
    tn = u.shape[1]

    def mm(a, b):
        return jnp.dot(a.astype(mm_dtype), b.astype(mm_dtype),
                       preferred_element_type=jnp.float32)

    # --- three_nn: pairwise squared distances in (m, TN) orientation ---
    # d2[j, i] = sum_d (k[j, d] - u[d, i])^2   -- 3 VPU broadcast-FMAs, no MXU.
    d2 = jnp.zeros((m, tn), jnp.float32)
    for d in range(3):
        diff = k[:, d:d + 1] - u[d:d + 1, :]          # (m,1) - (1,TN) -> (m,TN)
        d2 = d2 + diff * diff

    # Bit-packed argmin: for non-negative f32, bit-pattern order == value
    # order, so clearing the low `idx_bits` mantissa bits and OR-ing in the
    # row index makes every column's values unique (ties break to the smallest
    # row) while perturbing d2 by <= (m-1) ulps.  Each neighbour then costs a
    # single min + a single equality compare over (m, TN) instead of the
    # previous min / is_min / min_row / onehot sequence.
    keep = jnp.int32(~((1 << idx_bits) - 1))
    row = jax.lax.broadcasted_iota(jnp.int32, (m, 1), 0)
    packed_i = (jax.lax.bitcast_convert_type(d2, jnp.int32) & keep) | row
    d_work = jax.lax.bitcast_convert_type(packed_i, jnp.float32)   # (m, TN)

    w_mat = jnp.zeros((m, tn), jnp.float32)
    w_sum = jnp.zeros((1, tn), jnp.float32)
    for _ in range(3):
        pmin = jnp.min(d_work, axis=0, keepdims=True)              # (1, TN)
        onehot = d_work == pmin                                    # (m, TN)
        dmin = jax.lax.bitcast_convert_type(
            jax.lax.bitcast_convert_type(pmin, jnp.int32) & keep, jnp.float32)
        w = 1.0 / (jnp.sqrt(dmin) + 1e-8)                          # dist_recip
        w_mat = jnp.where(onehot, w, w_mat)
        w_sum = w_sum + w
        d_work = jnp.where(onehot, jnp.inf, d_work)                # inf sentinel

    # --- three_interpolate + channel concat + first MLP layer, all folded:
    #   x0 = W0[:, :C2] @ interp + W0[:, C2:] @ uf + b0
    #      = (G @ w_mat) * (1 / w_sum) + W0s @ uf + b0
    x = mm(g, w_mat) * (1.0 / w_sum) + mm(w0s_ref[...], uf) + b0_ref[...]
    x = jnp.maximum(x, 0.0)

    # --- remaining shared-MLP layers: 1x1 conv (+ folded eval-mode BN) + ReLU
    for li in range(n_rest):
        w_r = rest[2 * li]
        b_r = rest[2 * li + 1]
        x = mm(w_r[...], x) + b_r[...]
        x = jnp.maximum(x, 0.0)

    o_ref[0] = x.astype(o_ref.dtype)


def pointnet_fp_forward(unknown, known, unknow_feats, known_feats,
                        weights, biases, *, matmul_dtype=None):
    """unknown (B,n,3), known (B,m,3), unknow_feats (B,C1,n), known_feats (B,C2,m)."""
    B, n, _ = unknown.shape
    _, m, _ = known.shape
    C1 = unknow_feats.shape[1]
    C2 = known_feats.shape[1]
    n_layers = len(weights)
    c0 = weights[0].shape[0]
    c_out = weights[-1].shape[0]
    mm_dtype = jnp.float32 if matmul_dtype is None else matmul_dtype

    # Split layer 0 so the concat never materializes and fold its
    # interpolation half into the known features (tiny per-batch einsum):
    #   W0 @ cat(interp, uf) = (W0[:, :C2] @ kf) @ Wmat * inv + W0[:, C2:] @ uf
    w0 = weights[0]
    w0s = w0[:, C2:]
    b0 = biases[0]
    g = jnp.einsum('oc,bcm->bom', w0[:, :C2], known_feats,
                   preferred_element_type=jnp.float32)        # (B, c0, m)

    # ---- generation-aware n-tile / VMEM sizing ----
    try:
        vmem_cap = int(pltpu.get_tpu_info().vmem_capacity_bytes)
    except Exception:
        vmem_cap = 64 * 1024 * 1024            # v7x-conservative fallback
    vmem_budget = min(vmem_cap * 3 // 4, vmem_cap - 8 * 1024 * 1024)

    f32b = 4
    max_w = max(int(w.shape[0]) for w in weights)
    # bytes that scale with TN: ~6 live (m, TN) f32 temps in the NN phase plus
    # double-buffered per-tile channel blocks and the widest MLP intermediate.
    per_col = f32b * (6 * m + 2 * (3 + C1 + c_out) + 2 * max_w)
    # TN-independent residents: known (m,3) block (lane-padded to 128) and the
    # folded G block (both double-buffered), plus all MLP weights/biases.
    fixed = f32b * 2 * (m * 128 + c0 * m)
    fixed += 2 * f32b * (int(w0s.size) + sum(int(w.size) for w in weights[1:])
                         + sum(int(b.size) for b in biases))
    tn_cap = (vmem_budget - fixed) // max(per_col, 1)
    tn_cap = max(128, (tn_cap // 128) * 128)

    if n <= 128:
        tn = n                                  # single block == full extent
    else:
        tn = int(min(1024, tn_cap, (n // 128) * 128))   # lane-dense tiles

    # Point axis on lanes for the unknown coords (tiny host-side transpose).
    unknown_t = jnp.transpose(unknown, (0, 2, 1))               # (B, 3, n)

    idx_bits = max((m - 1).bit_length(), 1)

    in_specs = [
        pl.BlockSpec((1, 3, tn), lambda b, t: (b, 0, t)),     # unknown (transposed)
        pl.BlockSpec((1, m, 3), lambda b, t: (b, 0, 0)),      # known (resident over t)
        pl.BlockSpec((1, C1, tn), lambda b, t: (b, 0, t)),    # skip features
        pl.BlockSpec((1, c0, m), lambda b, t: (b, 0, 0)),     # folded known feats
        pl.BlockSpec(w0s.shape, lambda b, t: (0, 0)),
        pl.BlockSpec(b0.shape, lambda b, t: (0, 0)),
    ]
    args = [unknown_t, known, unknow_feats, g, w0s, b0]
    for wl, bl in zip(weights[1:], biases[1:]):
        in_specs.append(pl.BlockSpec(wl.shape, lambda b, t: (0, 0)))
        in_specs.append(pl.BlockSpec(bl.shape, lambda b, t: (0, 0)))
        args.append(wl)
        args.append(bl)

    kernel = functools.partial(_fp_kernel, n_layers - 1, mm_dtype, idx_bits)
    # No host-side padding / output slice: ragged last tiles read column-local
    # garbage that never crosses columns and is dropped on the masked writeback.
    out = pl.pallas_call(
        kernel,
        out_shape=jax.ShapeDtypeStruct((B, c_out, n), jnp.float32),
        grid=(B, pl.cdiv(n, tn)),
        in_specs=in_specs,
        out_specs=pl.BlockSpec((1, c_out, tn), lambda b, t: (b, 0, t)),
        compiler_params=pltpu.CompilerParams(
            dimension_semantics=("parallel", "parallel"),
            vmem_limit_bytes=int(vmem_budget)),
    )(*args)
    return out


def reference_forward(unknown, known, unknow_feats, known_feats, weights, biases):
    """Pure-JAX reference mirroring the PyTorch module (known/unknow_feats not None)."""
    d2 = jnp.sum((unknown[:, :, None, :] - known[:, None, :, :]) ** 2, axis=-1)
    neg_d2, idx = jax.lax.top_k(-d2, 3)
    dist = jnp.sqrt(jnp.maximum(-neg_d2, 0.0))
    dist_recip = 1.0 / (dist + 1e-8)
    norm = jnp.sum(dist_recip, axis=2, keepdims=True)
    weight = dist_recip / norm                                           # (B, n, 3)
    gathered = jnp.take_along_axis(known_feats[:, :, None, :],
                                   idx[:, None, :, :], axis=3)           # (B, C2, n, 3)
    interp = jnp.sum(gathered * weight[:, None, :, :], axis=-1)          # (B, C2, n)
    x = jnp.concatenate([interp, unknow_feats], axis=1)
    for wl, bl in zip(weights, biases):
        x = jnp.einsum('oi,bin->bon', wl, x) + bl[None, :, :]
        x = jnp.maximum(x, 0.0)
    return x


if __name__ == "__main__":
    key = jax.random.PRNGKey(0)
    B, n, m = 2, 16, 8
    C1, C2 = 4, 6
    mlp = [C2 + C1, 32, 16]          # mlp[0] must equal C2 + C1 (concat width)
    bn_eps = 1e-5

    k1, k2, k3, k4, kw = jax.random.split(key, 5)
    unknown = jax.random.normal(k1, (B, n, 3), jnp.float32)
    known = jax.random.normal(k2, (B, m, 3), jnp.float32)
    unknow_feats = jax.random.normal(k3, (B, C1, n), jnp.float32)
    known_feats = jax.random.normal(k4, (B, C2, m), jnp.float32)

    # Conv2d(kernel_size=1, bias=False) weights + BatchNorm2d (default init,
    # eval-mode running stats) folded into an affine: W_eff = scale*W, b_eff.
    weights, biases = [], []
    wkeys = jax.random.split(kw, len(mlp) - 1)
    for i in range(1, len(mlp)):
        cin, cout = mlp[i - 1], mlp[i]
        w = jax.random.normal(wkeys[i - 1], (cout, cin), jnp.float32) * 0.1
        gamma = jnp.ones((cout,), jnp.float32)
        beta = jnp.zeros((cout,), jnp.float32)
        running_mean = jnp.zeros((cout,), jnp.float32)
        running_var = jnp.ones((cout,), jnp.float32)
        scale = gamma / jnp.sqrt(running_var + bn_eps)
        weights.append(w * scale[:, None])
        biases.append((beta - running_mean * scale)[:, None])        # (cout, 1)

    out = pointnet_fp_forward(unknown, known, unknow_feats, known_feats,
                              weights, biases)
    out = jax.block_until_ready(out)

    ref = reference_forward(unknown, known, unknow_feats, known_feats,
                            weights, biases)
    assert out.shape == (B, mlp[-1], n)
    assert jnp.allclose(out, ref, rtol=1e-4, atol=1e-4), \
        float(jnp.max(jnp.abs(out - ref)))
    print("KERNEL_OK")
</pallas_src>

<mosaic_0001>
module attributes {stable_mosaic.version = 11 : i64} {
  func.func @_fp_kernel(%arg0: i32, %arg1: i32, %arg2: memref<1x3x16xf32, #tpu.memory_space<vmem>>, %arg3: memref<1x8x3xf32, #tpu.memory_space<vmem>>, %arg4: memref<1x4x16xf32, #tpu.memory_space<vmem>>, %arg5: memref<1x32x8xf32, #tpu.memory_space<vmem>>, %arg6: memref<32x4xf32, #tpu.memory_space<vmem>>, %arg7: memref<32x1xf32, #tpu.memory_space<vmem>>, %arg8: memref<16x32xf32, #tpu.memory_space<vmem>>, %arg9: memref<16x1xf32, #tpu.memory_space<vmem>>, %arg10: memref<1x16x16xf32, #tpu.memory_space<vmem>>) attributes {dimension_semantics = [#tpu.dimension_semantics<parallel>, #tpu.dimension_semantics<parallel>], iteration_bounds = array<i64: 2, 1>, scalar_prefetch = 0 : i64, scratch_operands = 0 : i64, tpu.core_type = #tpu.core_type<tc>, window_params = [{transform_indices = @transform_0, window_bounds = array<i64: 1, 3, 16>}, {transform_indices = @transform_1, window_bounds = array<i64: 1, 8, 3>}, {transform_indices = @transform_2, window_bounds = array<i64: 1, 4, 16>}, {transform_indices = @transform_3, window_bounds = array<i64: 1, 32, 8>}, {pipeline_mode = #tpu.pipeline_mode<synchronous>, transform_indices = @transform_4, window_bounds = array<i64: 32, 4>}, {pipeline_mode = #tpu.pipeline_mode<synchronous>, transform_indices = @transform_5, window_bounds = array<i64: 32, 1>}, {pipeline_mode = #tpu.pipeline_mode<synchronous>, transform_indices = @transform_6, window_bounds = array<i64: 16, 32>}, {pipeline_mode = #tpu.pipeline_mode<synchronous>, transform_indices = @transform_7, window_bounds = array<i64: 16, 1>}, {transform_indices = @transform_8, window_bounds = array<i64: 1, 16, 16>}]} {
    %c0 = arith.constant 0 : index
    %c0_0 = arith.constant 0 : index
    %c0_1 = arith.constant 0 : index
    %0 = vector.load %arg2[%c0, %c0_0, %c0_1] : memref<1x3x16xf32, #tpu.memory_space<vmem>>, vector<1x3x16xf32>
    %1 = vector.shape_cast %0 : vector<1x3x16xf32> to vector<3x16xf32>
    %c0_2 = arith.constant 0 : index
    %c0_3 = arith.constant 0 : index
    %c0_4 = arith.constant 0 : index
    %2 = vector.load %arg3[%c0_2, %c0_3, %c0_4] : memref<1x8x3xf32, #tpu.memory_space<vmem>>, vector<1x8x3xf32>
    %3 = vector.shape_cast %2 : vector<1x8x3xf32> to vector<8x3xf32>
    %c0_5 = arith.constant 0 : index
    %c0_6 = arith.constant 0 : index
    %c0_7 = arith.constant 0 : index
    %4 = vector.load %arg4[%c0_5, %c0_6, %c0_7] : memref<1x4x16xf32, #tpu.memory_space<vmem>>, vector<1x4x16xf32>
    %5 = vector.shape_cast %4 : vector<1x4x16xf32> to vector<4x16xf32>
    %c0_8 = arith.constant 0 : index
    %c0_9 = arith.constant 0 : index
    %c0_10 = arith.constant 0 : index
    %6 = vector.load %arg5[%c0_8, %c0_9, %c0_10] : memref<1x32x8xf32, #tpu.memory_space<vmem>>, vector<1x32x8xf32>
    %7 = vector.shape_cast %6 : vector<1x32x8xf32> to vector<32x8xf32>
    %cst = arith.constant 0.000000e+00 : f32
    %8 = vector.broadcast %cst : f32 to vector<8x16xf32>
    %9 = vector.extract_strided_slice %3 {offsets = [0, 0], sizes = [8, 1], strides = [1, 1]} : vector<8x3xf32> to vector<8x1xf32>
    %10 = vector.extract_strided_slice %1 {offsets = [0, 0], sizes = [1, 16], strides = [1, 1]} : vector<3x16xf32> to vector<1x16xf32>
    %11 = vector.broadcast %9 : vector<8x1xf32> to vector<8x16xf32>
    %12 = vector.broadcast %10 : vector<1x16xf32> to vector<8x16xf32>
    %13 = arith.subf %11, %12 : vector<8x16xf32>
    %14 = arith.mulf %13, %13 : vector<8x16xf32>
    %15 = arith.addf %8, %14 : vector<8x16xf32>
    %16 = vector.extract_strided_slice %3 {offsets = [0, 1], sizes = [8, 1], strides = [1, 1]} : vector<8x3xf32> to vector<8x1xf32>
    %17 = vector.extract_strided_slice %1 {offsets = [1, 0], sizes = [1, 16], strides = [1, 1]} : vector<3x16xf32> to vector<1x16xf32>
    %18 = vector.broadcast %16 : vector<8x1xf32> to vector<8x16xf32>
    %19 = vector.broadcast %17 : vector<1x16xf32> to vector<8x16xf32>
    %20 = arith.subf %18, %19 : vector<8x16xf32>
    %21 = arith.mulf %20, %20 : vector<8x16xf32>
    %22 = arith.addf %15, %21 : vector<8x16xf32>
    %23 = vector.extract_strided_slice %3 {offsets = [0, 2], sizes = [8, 1], strides = [1, 1]} : vector<8x3xf32> to vector<8x1xf32>
    %24 = vector.extract_strided_slice %1 {offsets = [2, 0], sizes = [1, 16], strides = [1, 1]} : vector<3x16xf32> to vector<1x16xf32>
    %25 = vector.broadcast %23 : vector<8x1xf32> to vector<8x16xf32>
    %26 = vector.broadcast %24 : vector<1x16xf32> to vector<8x16xf32>
    %27 = arith.subf %25, %26 : vector<8x16xf32>
    %28 = arith.mulf %27, %27 : vector<8x16xf32>
    %29 = arith.addf %22, %28 : vector<8x16xf32>
    %30 = tpu.iota {dimensions = array<i32: 0>} : vector<8x1xi32>
    %31 = tpu.bitcast %29 : vector<8x16xf32> -> vector<8x16xi32>
    %c-8_i32 = arith.constant -8 : i32
    %32 = vector.broadcast %c-8_i32 : i32 to vector<8x16xi32>
    %33 = arith.andi %31, %32 : vector<8x16xi32>
    %34 = vector.broadcast %30 : vector<8x1xi32> to vector<8x16xi32>
    %35 = arith.ori %33, %34 : vector<8x16xi32>
    %36 = tpu.bitcast %35 : vector<8x16xi32> -> vector<8x16xf32>
    %cst_11 = arith.constant 0.000000e+00 : f32
    %37 = vector.broadcast %cst_11 : f32 to vector<8x16xf32>
    %cst_12 = arith.constant 0.000000e+00 : f32
    %38 = vector.broadcast %cst_12 : f32 to vector<1x16xf32>
    %cst_13 = arith.constant dense<0x7F800000> : vector<16xf32>
    %39 = vector.multi_reduction <minimumf>, %36, %cst_13 [0] : vector<8x16xf32> to vector<16xf32>
    %40 = vector.shape_cast %39 : vector<16xf32> to vector<1x16xf32>
    %41 = vector.broadcast %40 : vector<1x16xf32> to vector<8x16xf32>
    %42 = arith.cmpf oeq, %36, %41 : vector<8x16xf32>
    %43 = tpu.bitcast %40 : vector<1x16xf32> -> vector<1x16xi32>
    %c-8_i32_14 = arith.constant -8 : i32
    %44 = vector.broadcast %c-8_i32_14 : i32 to vector<1x16xi32>
    %45 = arith.andi %43, %44 : vector<1x16xi32>
    %46 = tpu.bitcast %45 : vector<1x16xi32> -> vector<1x16xf32>
    %47 = math.sqrt %46 : vector<1x16xf32>
    %cst_15 = arith.constant 9.99999993E-9 : f32
    %48 = vector.broadcast %cst_15 : f32 to vector<1x16xf32>
    %49 = arith.addf %47, %48 : vector<1x16xf32>
    %cst_16 = arith.constant 1.000000e+00 : f32
    %50 = vector.broadcast %cst_16 : f32 to vector<1x16xf32>
    %51 = arith.divf %50, %49 : vector<1x16xf32>
    %52 = vector.shape_cast %51 : vector<1x16xf32> to vector<1x16xf32>
    %53 = vector.broadcast %52 : vector<1x16xf32> to vector<8x16xf32>
    %54 = arith.select %42, %53, %37 : vector<8x16xi1>, vector<8x16xf32>
    %55 = arith.addf %38, %51 : vector<1x16xf32>
    %cst_17 = arith.constant 0x7F800000 : f32
    %56 = vector.broadcast %cst_17 : f32 to vector<8x16xf32>
    %57 = arith.select %42, %56, %36 : vector<8x16xi1>, vector<8x16xf32>
    %cst_18 = arith.constant dense<0x7F800000> : vector<16xf32>
    %58 = vector.multi_reduction <minimumf>, %57, %cst_18 [0] : vector<8x16xf32> to vector<16xf32>
    %59 = vector.shape_cast %58 : vector<16xf32> to vector<1x16xf32>
    %60 = vector.broadcast %59 : vector<1x16xf32> to vector<8x16xf32>
    %61 = arith.cmpf oeq, %57, %60 : vector<8x16xf32>
    %62 = tpu.bitcast %59 : vector<1x16xf32> -> vector<1x16xi32>
    %c-8_i32_19 = arith.constant -8 : i32
    %63 = vector.broadcast %c-8_i32_19 : i32 to vector<1x16xi32>
    %64 = arith.andi %62, %63 : vector<1x16xi32>
    %65 = tpu.bitcast %64 : vector<1x16xi32> -> vector<1x16xf32>
    %66 = math.sqrt %65 : vector<1x16xf32>
    %cst_20 = arith.constant 9.99999993E-9 : f32
    %67 = vector.broadcast %cst_20 : f32 to vector<1x16xf32>
    %68 = arith.addf %66, %67 : vector<1x16xf32>
    %cst_21 = arith.constant 1.000000e+00 : f32
    %69 = vector.broadcast %cst_21 : f32 to vector<1x16xf32>
    %70 = arith.divf %69, %68 : vector<1x16xf32>
    %71 = vector.shape_cast %70 : vector<1x16xf32> to vector<1x16xf32>
    %72 = vector.broadcast %71 : vector<1x16xf32> to vector<8x16xf32>
    %73 = arith.select %61, %72, %54 : vector<8x16xi1>, vector<8x16xf32>
    %74 = arith.addf %55, %70 : vector<1x16xf32>
    %cst_22 = arith.constant 0x7F800000 : f32
    %75 = vector.broadcast %cst_22 : f32 to vector<8x16xf32>
    %76 = arith.select %61, %75, %57 : vector<8x16xi1>, vector<8x16xf32>
    %cst_23 = arith.constant dense<0x7F800000> : vector<16xf32>
    %77 = vector.multi_reduction <minimumf>, %76, %cst_23 [0] : vector<8x16xf32> to vector<16xf32>
    %78 = vector.shape_cast %77 : vector<16xf32> to vector<1x16xf32>
    %79 = vector.broadcast %78 : vector<1x16xf32> to vector<8x16xf32>
    %80 = arith.cmpf oeq, %76, %79 : vector<8x16xf32>
    %81 = tpu.bitcast %78 : vector<1x16xf32> -> vector<1x16xi32>
    %c-8_i32_24 = arith.constant -8 : i32
    %82 = vector.broadcast %c-8_i32_24 : i32 to vector<1x16xi32>
    %83 = arith.andi %81, %82 : vector<1x16xi32>
    %84 = tpu.bitcast %83 : vector<1x16xi32> -> vector<1x16xf32>
    %85 = math.sqrt %84 : vector<1x16xf32>
    %cst_25 = arith.constant 9.99999993E-9 : f32
    %86 = vector.broadcast %cst_25 : f32 to vector<1x16xf32>
    %87 = arith.addf %85, %86 : vector<1x16xf32>
    %cst_26 = arith.constant 1.000000e+00 : f32
    %88 = vector.broadcast %cst_26 : f32 to vector<1x16xf32>
    %89 = arith.divf %88, %87 : vector<1x16xf32>
    %90 = vector.shape_cast %89 : vector<1x16xf32> to vector<1x16xf32>
    %91 = vector.broadcast %90 : vector<1x16xf32> to vector<8x16xf32>
    %92 = arith.select %80, %91, %73 : vector<8x16xi1>, vector<8x16xf32>
    %93 = arith.addf %74, %89 : vector<1x16xf32>
    %cst_27 = arith.constant dense<0.000000e+00> : vector<32x16xf32>
    %94 = tpu.matmul %7, %92, %cst_27 {dimension_numbers = #tpu.dot_dimension_numbers<[1], [0], [0], [1], [0, 0, 1, 1], [], []>} : vector<32x8xf32>, vector<8x16xf32>, vector<32x16xf32> -> vector<32x16xf32>
    %cst_28 = arith.constant 1.000000e+00 : f32
    %95 = vector.broadcast %cst_28 : f32 to vector<1x16xf32>
    %96 = arith.divf %95, %93 : vector<1x16xf32>
    %97 = vector.broadcast %96 : vector<1x16xf32> to vector<32x16xf32>
    %98 = arith.mulf %94, %97 : vector<32x16xf32>
    %c0_29 = arith.constant 0 : index
    %c0_30 = arith.constant 0 : index
    %99 = vector.load %arg6[%c0_29, %c0_30] : memref<32x4xf32, #tpu.memory_space<vmem>>, vector<32x4xf32>
    %cst_31 = arith.constant dense<0.000000e+00> : vector<32x16xf32>
    %100 = tpu.matmul %99, %5, %cst_31 {dimension_numbers = #tpu.dot_dimension_numbers<[1], [0], [0], [1], [0, 0, 1, 1], [], []>} : vector<32x4xf32>, vector<4x16xf32>, vector<32x16xf32> -> vector<32x16xf32>
    %101 = arith.addf %98, %100 : vector<32x16xf32>
    %c0_32 = arith.constant 0 : index
    %c0_33 = arith.constant 0 : index
    %102 = vector.load %arg7[%c0_32, %c0_33] : memref<32x1xf32, #tpu.memory_space<vmem>>, vector<32x1xf32>
    %103 = vector.broadcast %102 : vector<32x1xf32> to vector<32x16xf32>
    %104 = arith.addf %101, %103 : vector<32x16xf32>
    %cst_34 = arith.constant 0.000000e+00 : f32
    %105 = vector.broadcast %cst_34 : f32 to vector<32x16xf32>
    %106 = arith.maximumf %104, %105 : vector<32x16xf32>
    %c0_35 = arith.constant 0 : index
    %c0_36 = arith.constant 0 : index
    %107 = vector.load %arg8[%c0_35, %c0_36] : memref<16x32xf32, #tpu.memory_space<vmem>>, vector<16x32xf32>
    %cst_37 = arith.constant dense<0.000000e+00> : vector<16x16xf32>
    %108 = tpu.matmul %107, %106, %cst_37 {dimension_numbers = #tpu.dot_dimension_numbers<[1], [0], [0], [1], [0, 0, 1, 1], [], []>} : vector<16x32xf32>, vector<32x16xf32>, vector<16x16xf32> -> vector<16x16xf32>
    %c0_38 = arith.constant 0 : index
    %c0_39 = arith.constant 0 : index
    %109 = vector.load %arg9[%c0_38, %c0_39] : memref<16x1xf32, #tpu.memory_space<vmem>>, vector<16x1xf32>
    %110 = vector.broadcast %109 : vector<16x1xf32> to vector<16x16xf32>
    %111 = arith.addf %108, %110 : vector<16x16xf32>
    %cst_40 = arith.constant 0.000000e+00 : f32
    %112 = vector.broadcast %cst_40 : f32 to vector<16x16xf32>
    %113 = arith.maximumf %111, %112 : vector<16x16xf32>
    %c0_41 = arith.constant 0 : index
    %c0_42 = arith.constant 0 : index
    %c0_43 = arith.constant 0 : index
    %114 = vector.load %arg10[%c0_41, %c0_42, %c0_43] : memref<1x16x16xf32, #tpu.memory_space<vmem>>, vector<1x16x16xf32>
    %115 = vector.shape_cast %114 : vector<1x16x16xf32> to vector<16x16xf32>
    %116 = vector.shape_cast %113 : vector<16x16xf32> to vector<1x16x16xf32>
    tpu.vector_store %arg10[%c0_41, %c0_42, %c0_43], %116 {strides = array<i32>} : memref<1x16x16xf32, #tpu.memory_space<vmem>>, vector<1x16x16xf32>,
    return
  }
  func.func @transform_0(%arg0: i32, %arg1: i32) -> (i32, i32, i32) {
    %c0_i32 = arith.constant 0 : i32
    %c0_i32_0 = arith.constant 0 : i32
    return %arg0, %c0_i32, %arg1 : i32, i32, i32
  }
  func.func @transform_1(%arg0: i32, %arg1: i32) -> (i32, i32, i32) {
    %c0_i32 = arith.constant 0 : i32
    %c0_i32_0 = arith.constant 0 : i32
    %c0_i32_1 = arith.constant 0 : i32
    return %arg0, %c0_i32, %c0_i32_0 : i32, i32, i32
  }
  func.func @transform_2(%arg0: i32, %arg1: i32) -> (i32, i32, i32) {
    %c0_i32 = arith.constant 0 : i32
    %c0_i32_0 = arith.constant 0 : i32
    return %arg0, %c0_i32, %arg1 : i32, i32, i32
  }
  func.func @transform_3(%arg0: i32, %arg1: i32) -> (i32, i32, i32) {
    %c0_i32 = arith.constant 0 : i32
    %c0_i32_0 = arith.constant 0 : i32
    %c0_i32_1 = arith.constant 0 : i32
    return %arg0, %c0_i32, %c0_i32_0 : i32, i32, i32
  }
  func.func @transform_4(%arg0: i32, %arg1: i32) -> (i32, i32) {
    %c0_i32 = arith.constant 0 : i32
    %c0_i32_0 = arith.constant 0 : i32
    %c0_i32_1 = arith.constant 0 : i32
    return %c0_i32, %c0_i32_0 : i32, i32
  }
  func.func @transform_5(%arg0: i32, %arg1: i32) -> (i32, i32) {
    %c0_i32 = arith.constant 0 : i32
    %c0_i32_0 = arith.constant 0 : i32
    %c0_i32_1 = arith.constant 0 : i32
    return %c0_i32, %c0_i32_0 : i32, i32
  }
  func.func @transform_6(%arg0: i32, %arg1: i32) -> (i32, i32) {
    %c0_i32 = arith.constant 0 : i32
    %c0_i32_0 = arith.constant 0 : i32
    %c0_i32_1 = arith.constant 0 : i32
    return %c0_i32, %c0_i32_0 : i32, i32
  }
  func.func @transform_7(%arg0: i32, %arg1: i32) -> (i32, i32) {
    %c0_i32 = arith.constant 0 : i32
    %c0_i32_0 = arith.constant 0 : i32
    %c0_i32_1 = arith.constant 0 : i32
    return %c0_i32, %c0_i32_0 : i32, i32
  }
  func.func @transform_8(%arg0: i32, %arg1: i32) -> (i32, i32, i32) {
    %c0_i32 = arith.constant 0 : i32
    %c0_i32_0 = arith.constant 0 : i32
    return %arg0, %c0_i32, %arg1 : i32, i32, i32
  }
}

</mosaic_0001>

<bundles_post_ra>
// kernel: tpu_custom_call.1
= control target key start
LH: loop header
LB: loop body
LE: loop exit
PB: predicated region body
PF: predicated region fallthrough
CT: control target
= control target key end

     0   :  { %13 = vsyncpa [#allocation3], 0  ;;  %s1344_s0 = inlined_call_operand.vmem [shape: f32[2,3,16], index: 0, kind: input, shape index: {}]   ;;  %s1345_s1 = inlined_call_operand.vmem [shape: f32[2,8,3], index: 1, kind: input, shape index: {}]   ;;  %s1346_s2 = inlined_call_operand.vmem [shape: f32[2,4,16], index: 2, kind: input, shape index: {}]   ;;  %s1347_s3 = inlined_call_operand.vmem [shape: f32[2,32,8], index: 3, kind: input, shape index: {}]   ;;  %s1348_s4 = inlined_call_operand.vmem [shape: f32[32,4], index: 4, kind: input, shape index: {}]   ;;  %s1349_s5 = inlined_call_operand.vmem [shape: f32[32,1], index: 5, kind: input, shape index: {}]   ;;  %s1350_s6 = inlined_call_operand.vmem [shape: f32[16,32], index: 6, kind: input, shape index: {}]   ;;  %s1351_s7 = inlined_call_operand.vmem [shape: f32[16,1], index: 7, kind: input, shape index: {}]   ;;  %s1352_s8 = inlined_call_operand.hbm [shape: f32[2,16,16], index: 8, kind: output, shape index: {}]  }
   0x1   :  { %15 = vsyncpa [#allocation3 + $0x1], 0  ;;  %s1122_s27 = smov 0   ;;  %s1124_s28 = smov 0  }
   0x2   :  { %s1126_s29 = smov 0   ;;  %s1128_s30 = smov 0  }
   0x3   :  { %s1130_s9 = smov 0   ;;  %s1132_s10 = smov 0  }
   0x4 LB: > { %s881_s11 = sadd.s32 4294967295, %s1070_s10   ;;  %s882_s12 = sadd.s32 4294967294, %s1070_s10   ;;  %s1070_s10 = sphi %s1132_s10, %s21_s10   ;;  %s1066_s9 = sphi %s1130_s9, %s1361_s9   ;;  %s1062_s30 = sphi %s1128_s30, %s1360_s30   ;;  %s1058_s29 = sphi %s1126_s29, %s1359_s29   ;;  %s1054_s28 = sphi %s1124_s28, %s1358_s28   ;;  %s1050_s27 = sphi %s1122_s27, %s1357_s27  }
   0x5   : > { %s33_s13 = sadd.s32 1, %s1066_s9  ;;  %s234_s14 = sadd.s32 1, %s1058_s29 }
   0x6   : > { %p35_p0 = scmp.ge.s32.totalorder %s33_s13, 2  ;;  %p244_p1 = scmp.ne.s32.totalorder %s1058_s29, %s1054_s28 }
   0x7   : > { %p245_p2 = scmp.eq.s32.totalorder %s881_s11, 1  ;;  %p250_p3 = scmp.ne.s32.totalorder %s1054_s28, %s1050_s27 }
   0x8   : > { %s1363_s13 = smov (%p35_p0, %s33_s13), 0  ;;  %p251_p5 = scmp.eq.s32.totalorder %s882_s12, 1 }
   0x9   : > { %p1162_p4 = por %p245_p2, %p244_p1  ;;  %s229_s16 = ssub.s32 %s1066_s9, %s1363_s13 }
   0xa   : > { %p885_p6 = scmp.ge.s32.totalorder %s1070_s10, 1  ;;  %p232_p7 = scmp.eq.s32.totalorder %s229_s16, 0 }
   0xb   : > { %p1169_p8 = por %p251_p5, %p250_p3  ;;  %p316_p9 = scmp.lt.s32.totalorder %s1070_s10, 3 }
   0xc   : > { %s1175_s18 = scalar_select %p232_p7, %s1058_s29, %s234_s14  }
   0xd   : > { %p317_p10 = pnand %p885_p6, %p316_p9 }
   0xe   : > { %p368_p11 = scmp.lt.s32.totalorder (!%p317_p10), %s1062_s30, 1  ;;  %s365_s25 = sand.u32 (!%p317_p10), 1, %s1054_s28  }
   0xf   : > { %320 = sbr.rel (%p317_p10) target bundleno = 559 (0x22f), region = 52 }
  0x14   : > { %v1072_v0 = vmov 0   ;;  %v1073_v1 = vmov 2   ;;  %s1179_s19 = scalar_select %p368_p11, %s1062_s30, 1  ;;  %v1074_v3 = vmov 1   ;;  %v423_v16 = vlaneseq }
  0x15   : > { %972 = vset.pattern.permute.xlu0 %v1072_v0  ;;  %974 = vset.pattern.permute.xlu1 %v1073_v1  ;;  %vm429_vm0 = vcmask 130048   ;;  %vm633_vm7 = vcmask 1043456   ;;  %vm620_vm14 = vcmask 31744  }
  0x16   : > { %976 = vset.pattern.permute.xlu2 %v1072_v0  ;;  %s888_s20 = sshll.u32 %s1179_s19, 3  ;;  %s887_s24 = sshll.u32 %s1179_s19, 2  ;;  %v424_v19 = vshrl.u32 %v423_v16, 7 }
  0x17   : > { %s378_s23 = scalar_lea.vmem %s1345_s1, %s888_s20  ;;  %s374_s11 = scalar_lea.vmem %s1344_s0, %s887_s24 }
  0x18   : > { %v392_v2 = vld [vmem:[%s378_s23] sm:$0xff]  ;;  %s385_s16 = scalar_lea.vmem %s1346_s2, %s887_s24  ;;  %s908_s21 = sshll.u32 %s1179_s19, 5 }
  0x19   : > { %400 = vperm.xlu0 %972, %v392_v2   ;;  %416 = vperm.xlu1 %974, %v392_v2   ;;  %v391_v5 = vld [vmem:[%s374_s11] sm:$0x7]  ;;  %s390_s26 = scalar_lea.vmem %s1347_s3, %s908_s21  ;;  %s909_s19 = sshll.u32 %s1062_s30, 4 }
  0x1a   : > { %v403_v6 = vperm.slane %v391_v5, 0  ;;  %v419_v7 = vperm.slane %v391_v5, 2  ;;  %v411_v9 = vperm.slane %v391_v5, 1  ;;  %s751_s30 = scalar_lea.sflag [#allocation3], %s365_s25 }
  0x21   : > { %973 = vset.pattern.permute.xlu0 %v1074_v3  ;;  %975 = vset.pattern.permute.xlu1 %v1072_v0 }
  0x22   : > { %408 = vperm.xlu0 %973, %v392_v2  }
  0x2a   : > { %977 = vset.pattern.permute.xlu0 %v1072_v0 }
  0x8b   : > { %v401_v4 = vpop.permute.xlu0 %400  ;;  %v417_v8 = vpop.permute.xlu1 %416 }
  0x8c   : > { %v404_v10 = vsub.f32 %v401_v4, %v403_v6  ;;  %v420_v11 = vsub.f32 %v417_v8, %v419_v7 }
  0x8e   : > { %v405_v14 = vmul.f32 %v404_v10, %v404_v10  ;;  %v421_v17 = vmul.f32 %v420_v11, %v420_v11 }
  0x94   : > { %v409_v12 = vpop.permute.xlu0 %408 }
  0x95   : > { %v412_v13 = vsub.f32 %v409_v12, %v411_v9 }
  0x97   : > { %v413_v15 = vmul.f32 %v412_v13, %v412_v13  ;;  %v1233_v13 = vld [vmem:[%s385_s16] sm:$0xf]  ;;  %s763_s16 = scalar_lea.hbm %s1352_s8, %s909_s19  ;;  %s1012_s19 = scalar_lea.hbm %s1352_s8, 32 }
  0x98   : > { %911 = vmatpush.msk.msra.mxu1 %vm633_vm7, %v1233_v13  ;;  %s766_s21 = sshll.u32 %s763_s16, 4  ;;  %s767_s21 = int_to_ptr.hbm [resolvable:$true] %s766_s21 }
  0x99   : > { %v414_v18 = vadd.f32 %v413_v15, %v405_v14  ;;  %s1006_s22 = sshra.s32 %s767_s21, 4  ;;  %s1007_s22 = int_to_ptr.hbm [resolvable:$true] %s1006_s22 }
  0x9a   : > { %s1008_s23 = scalar_lea.hbm %s1007_s22, 16  ;;  %p1013_p1 = scmp.lt.s32.totalorder %s1007_s22, %s1352_s8 }
  0x9b   : > { %v422_v20 = vadd.f32 %v421_v17, %v414_v18  ;;  %p1009_p12 = scmp.ne.s32.totalorder %s1007_s22, %s1008_s23  ;;  %p1014_p2 = scmp.lt.s32.totalorder %s1012_s19, %s1008_s23 }
  0x9d   : > { %v426_v21 = vand.u32 4294967288, %v422_v20  ;;  %p1010_p13 = pnand %p1009_p12, %p1162_p4  ;;  %p1015_p3 = por %p1014_p2, %p1013_p1 }
  0x9f   : > { %v1191_v22 = vor.u32 %v426_v21, %v424_v19  ;;  %p1011_p0 = pneg %p1010_p13 }
  0xa1   : > { %v430_v23 = vsel %vm429_vm0, %v1191_v22, inf  ;;  %p1016_p5 = pnand %p1015_p3, %p1011_p0 }
  0xa2   : > { %v431_v24 = vrot.slane %v430_v23, 4 }
  0xa4   : > { %v432_v25 = vmin.f32 %v430_v23, %v431_v24 }
  0xa6   : > { %v433_v26 = vrot.slane %v432_v25, 2 }
  0xa8   : > { %v434_v27 = vmin.f32 %v432_v25, %v433_v26 }
  0xaa   : > { %v435_v28 = vrot.slane %v434_v27, 1 }
  0xac   : > { %v1195_v29 = vmin.f32 %v434_v27, %v435_v28 }
  0xae   : > { %vm437_vm1 = vcmp.eq.f32.partialorder %v1191_v22, %v1195_v29  ;;  %v439_v30 = vand.u32 4294967288, %v1195_v29  ;;  %v396_v29 = vld [vmem:[%s390_s26 + $0x10] sm:$0xff] }
  0xaf   : > { %v1204_v31 = vsel %vm437_vm1, inf, %v1191_v22  ;;  %v704_v22 = vld [vmem:[%s1351_s7] sm:$0xff] }
  0xb0   : > { %978 = vrsqrt.f32 %v439_v30  ;;  %v472_v32 = vsel %vm429_vm0, %v1204_v31, inf  ;;  %vm448_vm3 = vcmp.eq.f32.partialorder %v439_v30, inf  ;;  %v451_v51 = vand.u32 2147483648, %v439_v30 }
  0xb1   : > { %v473_v33 = vrot.slane %v472_v32, 4  ;;  %vm450_vm4 = vcmp.eq.f32.partialorder %v439_v30, 0.0 }
  0xb3   : > { %v474_v34 = vmin.f32 %v472_v32, %v473_v33  ;;  %v617_v33 = vld [vmem:[%s1348_s4 + $0x8] sm:$0xff] }
  0xb4   : > { %898 = vmatmul.msk.f32.vlgmr.msra.gmra.mxu1 %vm620_vm14, %v617_v33 }
  0xb5   : > { %v475_v36 = vrot.slane %v474_v34, 2 }
  0xb6   : > { %v979_v35 = vpop.eup %978 }
  0xb7   : > { %v442_v37 = vmul.f32 %v979_v35, %v439_v30  ;;  %v476_v38 = vmin.f32 %v474_v34, %v475_v36  ;;  %v673_v34 = vld [vmem:[%s1349_s5 + $0x18] sm:$0xff] }
  0xb8   : > { %691 = vperm.xlu1 %975, %v673_v34  }
  0xb9   : > { %v443_v39 = vmul.f32 %v979_v35, %v442_v37  ;;  %v477_v40 = vrot.slane %v476_v38, 1 }
  0xbb   : > { %v444_v41 = vmul.f32 0.5, %v443_v39  ;;  %v1208_v42 = vmin.f32 %v476_v38, %v477_v40 }
  0xbd   : > { %v445_v43 = vsub.f32 1.5, %v444_v41  ;;  %vm479_vm2 = vcmp.eq.f32.partialorder %v1204_v31, %v1208_v42  ;;  %v481_v44 = vand.u32 4294967288, %v1208_v42  ;;  %v397_v42 = vld [vmem:[%s390_s26 + $0x18] sm:$0xff] }
  0xbe   : > { %v1217_v46 = vsel %vm479_vm2, inf, %v1204_v31  ;;  %v616_v31 = vld [vmem:[%s1348_s4] sm:$0xff] }
  0xbf   : > { %v446_v45 = vmul.f32 %v979_v35, %v445_v43  ;;  %980 = vrsqrt.f32 %v481_v44  ;;  %v514_v48 = vsel %vm429_vm0, %v1217_v46, inf  ;;  %vm490_vm5 = vcmp.eq.f32.partialorder %v481_v44, inf }
  0xc0   : > { %v515_v49 = vrot.slane %v514_v48, 4  ;;  %v493_v4 = vand.u32 2147483648, %v481_v44  ;;  %vm492_vm6 = vcmp.eq.f32.partialorder %v481_v44, 0.0 }
  0xc1   : > { %v447_v47 = vmul.f32 %v446_v45, %v439_v30 }
  0xc2   : > { %v516_v52 = vmin.f32 %v514_v48, %v515_v49  ;;  %v618_v48 = vld [vmem:[%s1348_s4 + $0x10] sm:$0xff]  ;;  %v670_v49 = vld [vmem:[%s1349_s5] sm:$0xff] }
  0xc3   : > { %v449_v50 = vsel %vm448_vm3, %v439_v30, %v447_v47  ;;  %899 = vmatmul.msk.f32.gmra.mxu1 %vm620_vm14, %v618_v48  ;;  %676 = vperm.xlu1 %975, %v670_v49   ;;  %v702_v48 = vld [vmem:[%s1350_s6] sm:$0xff]  ;;  %v703_v49 = vld [vmem:[%s1350_s6 + $0x8] sm:$0xff] }
  0xc4   : > { %v452_v53 = vsel %vm450_vm4, %v451_v51, %v449_v50  ;;  %v517_v55 = vrot.slane %v516_v52, 2  ;;  %v672_v50 = vld [vmem:[%s1349_s5 + $0x10] sm:$0xff] }
  0xc5   : > { %v981_v54 = vpop.eup %980  ;;  %v1221_v56 = vadd.f32 1e-08, %v452_v53  ;;  %686 = vperm.xlu2 %976, %v672_v50  }
  0xc6   : > { %v484_v57 = vmul.f32 %v981_v54, %v481_v44  ;;  %v518_v58 = vmin.f32 %v516_v52, %v517_v55 }
  0xc7   : > { %982 = vrcp.f32 %v1221_v56  ;;  %vm459_vm9 = vweird.f32 %v1221_v56  ;;  %v463_v23 = vand.u32 2147483647, %v1221_v56  ;;  %v465_v24 = vand.u32 2147483648, %v1221_v56 }
  0xc8   : > { %v485_v59 = vmul.f32 %v981_v54, %v484_v57  ;;  %v519_v60 = vrot.slane %v518_v58, 1 }
  0xc9   : > { %v466_v38 = vor.u32 1.1754944e-38, %v465_v24  ;;  %vm464_vm4 = vcmp.eq.f32.partialorder %v463_v23, 8.507059e+37 }
  0xca   : > { %v486_v61 = vmul.f32 0.5, %v485_v59  ;;  %v1224_v62 = vmin.f32 %v518_v58, %v519_v60 }
  0xcc   : > { %v487_v63 = vsub.f32 1.5, %v486_v61  ;;  %v523_v0 = vand.u32 4294967288, %v1224_v62 }
  0xcd   : > { %v983_v2 = vpop.eup %982 }
  0xce   : > { %v488_v1 = vmul.f32 %v981_v54, %v487_v63  ;;  %984 = vrsqrt.f32 %v523_v0  ;;  %v455_v6 = vmul.f32 %v983_v2, %v1221_v56  ;;  %vm460_vm8 = vweird.f32 %v983_v2  ;;  %v619_v54 = vld [vmem:[%s1348_s4 + $0x18] sm:$0xff]  ;;  %v671_v56 = vld [vmem:[%s1349_s5 + $0x8] sm:$0xff] }
  0xcf   : > { %vm1240_vm11 = vmor %vm459_vm9, %vm460_vm8  ;;  %vm532_vm12 = vcmp.eq.f32.partialorder %v523_v0, inf  ;;  %vm534_vm13 = vcmp.eq.f32.partialorder %v523_v0, 0.0  ;;  %v535_v32 = vand.u32 2147483648, %v523_v0  ;;  %900 = vmatmul.msk.f32.gmra.mxu1 %vm620_vm14, %v619_v54  ;;  %681 = vperm.xlu2 %976, %v671_v56  }
  0xd0   : > { %v489_v3 = vmul.f32 %v488_v1, %v481_v44  ;;  %v456_v10 = vsub.f32 1.0, %v455_v6 }
  0xd2   : > { %v491_v5 = vsel %vm490_vm5, %v481_v44, %v489_v3  ;;  %v457_v14 = vmul.f32 %v983_v2, %v456_v10  ;;  %v395_v3 = vld [vmem:[%s390_s26 + $0x8] sm:$0xff] }
  0xd3   : > { %v494_v7 = vsel %vm492_vm6, %v493_v4, %v491_v5 }
  0xd4   : > { %v495_v8 = vadd.f32 1e-08, %v494_v7  ;;  %v985_v9 = vpop.eup %984  ;;  %v458_v19 = vadd.f32 %v983_v2, %v457_v14 }
  0xd5   : > { %v526_v11 = vmul.f32 %v985_v9, %v523_v0 }
  0xd6   : > { %986 = vrcp.f32 %v495_v8  ;;  %v507_v25 = vand.u32 2147483648, %v495_v8  ;;  %v505_v27 = vand.u32 2147483647, %v495_v8  ;;  %v462_v35 = vsel %vm1240_vm11, %v983_v2, %v458_v19  ;;  %v394_v2 = vld [vmem:[%s390_s26] sm:$0xff]  ;;  %s886_s26 = sshll.u32 %s365_s25, 4 }
  0xd7   : > { %v527_v12 = vmul.f32 %v985_v9, %v526_v11  ;;  %vm501_vm15 = vweird.f32 %v495_v8  ;;  %v467_v44 = vsel %vm464_vm4, %v466_v38, %v462_v35  ;;  %vm521_vm11 = vcmp.eq.f32.partialorder %v1217_v46, %v1224_v62  ;;  %708 = vperm.xlu2 %976, %v704_v22   ;;  %s367_s11 = scalar_lea.vmem [#allocation2], %s886_s26 }
  0xd8   : > { %v508_v39 = vor.u32 1.1754944e-38, %v507_v25  ;;  %vm506_vm5 = vcmp.eq.f32.partialorder %v505_v27, 8.507059e+37  ;;  %v469_v61 = vsel %vm437_vm1, %v467_v44, 0.0  ;;  %s764_s20 = sshll.u32 %s367_s11, 4  ;;  %s765_s20 = int_to_ptr.vmem [resolvable:$true] %s764_s20 }
  0xd9   : > { %v528_v15 = vmul.f32 0.5, %v527_v12 }
  0xdb   : > { %v529_v18 = vsub.f32 1.5, %v528_v15 }
  0xdc   : > { %v987_v16 = vpop.eup %986 }
  0xdd   : > { %v497_v17 = vmul.f32 %v987_v16, %v495_v8  ;;  %v530_v21 = vmul.f32 %v985_v9, %v529_v18  ;;  %vm502_vm10 = vweird.f32 %v987_v16 }
  0xde   : > { %vm503_vm3 = vmor %vm501_vm15, %vm502_vm10 }
  0xdf   : > { %v498_v20 = vsub.f32 1.0, %v497_v17  ;;  %v531_v28 = vmul.f32 %v530_v21, %v523_v0 }
  0xe1   : > { %v499_v26 = vmul.f32 %v987_v16, %v498_v20  ;;  %v533_v37 = vsel %vm532_vm12, %v523_v0, %v531_v28  ;;  %vm555_vm12 = vcmask 64512  }
  0xe2   : > { %v536_v40 = vsel %vm534_vm13, %v535_v32, %v533_v37 }
  0xe3   : > { %v500_v36 = vadd.f32 %v987_v16, %v499_v26  ;;  %v537_v43 = vadd.f32 1e-08, %v536_v40 }
  0xe5   : > { %v504_v41 = vsel %vm503_vm3, %v987_v16, %v500_v36  ;;  %988 = vrcp.f32 %v537_v43  ;;  %v549_v55 = vand.u32 2147483648, %v537_v43  ;;  %v547_v58 = vand.u32 2147483647, %v537_v43  ;;  %v705_v16 = vld [vmem:[%s1351_s7 + $0x8] sm:$0xff] }
  0xe6   : > { %v509_v45 = vsel %vm506_vm5, %v508_v39, %v504_v41  ;;  %vm543_vm8 = vweird.f32 %v537_v43  ;;  %713 = vperm.xlu0 %977, %v705_v16  }
  0xe7   : > { %v512_v47 = vadd.f32 %v509_v45, %v467_v44  ;;  %v550_v60 = vor.u32 1.1754944e-38, %v549_v55  ;;  %vm548_vm10 = vcmp.eq.f32.partialorder %v547_v58, 8.507059e+37  ;;  %v511_v0 = vsel %vm479_vm2, %v509_v45, %v469_v61 }
  0xeb   : > { %v989_v51 = vpop.eup %988 }
  0xec   : > { %v539_v52 = vmul.f32 %v989_v51, %v537_v43  ;;  %vm544_vm6 = vweird.f32 %v989_v51 }
  0xed   : > { %vm545_vm9 = vmor %vm543_vm8, %vm544_vm6 }
  0xee   : > { %v540_v53 = vsub.f32 1.0, %v539_v52 }
  0xf0   : > { %v541_v57 = vmul.f32 %v989_v51, %v540_v53 }
  0xf2   : > { %v542_v59 = vadd.f32 %v989_v51, %v541_v57 }
  0xf4   : > { %v546_v63 = vsel %vm545_vm9, %v989_v51, %v542_v59 }
  0xf5   : > { %v551_v1 = vsel %vm548_vm10, %v550_v60, %v546_v63 }
  0xf6   : > { %v553_v4 = vsel %vm521_vm11, %v551_v1, %v511_v0  ;;  %v554_v5 = vadd.f32 %v551_v1, %v512_v47 }
  0xf7   : > { %583 = vmatpush.msra.mxu0 %v553_v4  ;;  %910 = vmatpush.msra.mxu3 %v553_v4 }
  0xf8   : > { %892 = vmatmul.msk.f32.vlgmr.msra.gmra.mxu0 %vm555_vm12, %v394_v2  ;;  %893 = vmatmul.msk.f32.vlgmr.msra.gmra.mxu3 %vm555_vm12, %v395_v3  ;;  %990 = vrcp.f32 %v554_v5  ;;  %v608_v11 = vand.u32 2147483648, %v554_v5  ;;  %vm602_vm2 = vweird.f32 %v554_v5 }
  0xf9   : > { %896 = vmatpush.msk.msrb.mxu0 %vm633_vm7, %v1233_v13  ;;  %v606_v13 = vand.u32 2147483647, %v554_v5 }
  0xfa   : > { %v609_v18 = vor.u32 1.1754944e-38, %v608_v11 }
  0xfb   : > { %vm607_vm13 = vcmp.eq.f32.partialorder %v606_v13, 8.507059e+37 }
  0xfe   : > { %v991_v46 = vpop.eup %990 }
  0xff   : > { %v598_v62 = vmul.f32 %v991_v46, %v554_v5  ;;  %vm603_vm1 = vweird.f32 %v991_v46 }
 0x100   : > { %894 = vmatmul.msk.f32.gmra.mxu3 %vm555_vm12, %v396_v29  ;;  %897 = vmatmul.msk.f32.vlgmr.msrb.gmra.mxu0 %vm620_vm14, %v616_v31  ;;  %vm604_vm7 = vmor %vm602_vm2, %vm603_vm1  ;;  %vm716_vm14 = vcmask 261120  }
 0x101   : > { %v599_v7 = vsub.f32 1.0, %v598_v62 }
 0x103   : > { %v600_v9 = vmul.f32 %v991_v46, %v599_v7 }
 0x105   : > { %v601_v10 = vadd.f32 %v991_v46, %v600_v9 }
 0x107   : > { %v605_v17 = vsel %vm604_vm7, %v991_v46, %v601_v10 }
 0x108   : > { %895 = vmatmul.msk.f32.gmra.mxu3 %vm555_vm12, %v397_v42  ;;  %v610_v20 = vsel %vm607_vm13, %v609_v18, %v605_v17 }
 0x11f   : > { %v687_v19 = vpop.permute.xlu2 %686 }
 0x129   : > { %v682_v35 = vpop.permute.xlu2 %681 }
 0x12a   : > { %v692_v21 = vpop.permute.xlu1 %691 }
 0x131   : > { %v657_v6 = vpop.f32.mrf.mxu1  ;;  %v709_v50 = vpop.permute.xlu2 %708 }
 0x135   : > { %v677_v39 = vpop.permute.xlu1 %676 }
 0x140   : > { %v660_v12 = vpop.f32.mrf.mxu1 }
 0x14c   : > { %v663_v26 = vpop.f32.mrf.mxu1 }
 0x158   : > { %v714_v54 = vpop.permute.xlu0 %713 }
 0x175   : > { %v585_v14 = vpop.f32.mrf.mxu0 }
 0x176   : > { %v612_v32 = vmul.f32 %v610_v20, %v585_v14 }
 0x17b   : > { %v588_v8 = vpop.f32.mrf.mxu3 }
 0x17c   : > { %v613_v24 = vmul.f32 %v610_v20, %v588_v8 }
 0x17d   : > { %v654_v30 = vpop.f32.mrf.mxu0 }
 0x17e   : > { %v667_v33 = vadd.f32 %v657_v6, %v613_v24  ;;  %v666_v36 = vadd.f32 %v654_v30, %v612_v32 }
 0x180   : > { %v695_v40 = vadd.f32 %v682_v35, %v667_v33  ;;  %v694_v43 = vadd.f32 %v677_v39, %v666_v36 }
 0x182   : > { %v699_v45 = vmax.f32 %v695_v40, 0.0  ;;  %v698_v47 = vmax.f32 %v694_v43, 0.0 }
 0x183   : > { %v591_v15 = vpop.f32.mrf.mxu3 }
 0x184   : > { %v614_v23 = vmul.f32 %v610_v20, %v591_v15 }
 0x186   : > { %v668_v27 = vadd.f32 %v660_v12, %v614_v23 }
 0x188   : > { %v696_v38 = vadd.f32 %v687_v19, %v668_v27 }
 0x18a   : > { %v700_v44 = vmax.f32 %v696_v38, 0.0 }
 0x18b   : > { %v594_v25 = vpop.f32.mrf.mxu3 }
 0x18c   : > { %v615_v28 = vmul.f32 %v610_v20, %v594_v25 }
 0x18e   : > { %v669_v34 = vadd.f32 %v663_v26, %v615_v28 }
 0x190   : > { %v697_v37 = vadd.f32 %v692_v21, %v669_v34 }
 0x192   : > { %v701_v41 = vmax.f32 %v697_v37, 0.0 }
 0x194   : > { %735 = vmatpush.msra.mxu2 %v701_v41 }
 0x196   : > { %736 = vmatpush.msra.mxu2 %v700_v44 }
 0x198   : > { %737 = vmatpush.msra.mxu2 %v699_v45 }
 0x19a   : > { %738 = vmatpush.msra.mxu2 %v698_v47 }
 0x19b   : > { %901 = vmatmul.msk.f32.vlgmr.msra.gmra.mxu2 %vm716_vm14, %v702_v48 }
 0x1a3   : > { %902 = vmatmul.msk.f32.gmra.mxu2 %vm716_vm14, %v703_v49 }
 0x21e   : > { %v740_v51 = vpop.f32.mrf.mxu2 }
 0x21f   : > { %v741_v52 = vadd.f32 %v740_v51, %v709_v50 }
 0x221   : > { %v746_v53 = vmax.f32 %v741_v52, 0.0 }
 0x223   : > { %748 = vst.msk [vmem:[%s367_s11] sm:$0xff] %vm429_vm0, %v746_v53 }
 0x226   : > { %v743_v55 = vpop.f32.mrf.mxu2 }
 0x227   : > { %v744_v56 = vadd.f32 %v743_v55, %v714_v54 }
 0x229   : > { %v747_v57 = vmax.f32 %v744_v56, 0.0 }
 0x22b   : > { %749 = vst.msk [vmem:[%s367_s11 + $0x8] sm:$0xff] %vm429_vm0, %v747_v57 }
 0x22c   : > { %1019 = shalt.err (!%p1016_p5)
}
 0x22d   : > { %s1075_s25 = smov 128   ;;  %s1076_s11 = smov 8  }
 0x22e   : > { %912 = dma.vmem_to_hbm [thread:$0]  (%p1162_p4), %s765_s20, 256, %s767_s21, %s751_s30, %s1075_s25, %s1075_s25, %s1076_s11  }
 0x22f PF: > { %p918_p6 = scmp.ge.s32.totalorder %s1070_s10, 2  ;;  %s781_s16 = sand.u32 1, %s1050_s27  }
 0x230   : > { %s782_s24 = scalar_lea.sflag [#allocation3], %s781_s16 }
 0x231   : > { %p915_p7 = pnand %p918_p6, %p1169_p8 }
 0x233   : > { %p916_p9 = pneg %p915_p7 }
 0x235   : > { %1045 = dma.done.wait (%p916_p9), %s782_s24, 256  }
 0x236   : > { %1047 = vsyncadd (%p916_p9), %s782_s24, 4294967040  ;;  %s21_s10 = sadd.s32 1, %s1070_s10   ;;  %s1357_s27 = smov %s1054_s28 }
 0x237   : > { %p18_p10 = scmp.ge.s32.totalorder %s21_s10, 4   ;;  %s1358_s28 = smov %s1058_s29 }
 0x238   : > { %s1359_s29 = smov %s1175_s18  ;;  %s1360_s30 = smov %s1066_s9 }
 0x239   : > { %s1361_s9 = smov %s1363_s13  ;;  %20 = sbr.rel (!%p18_p10) target bundleno = 4 (0x4), region = 96 }
 0x23e   :  { %788 = vsyncpa [#allocation3], 1 }
 0x23f   :  { %790 = vsyncpa [#allocation3 + $0x1], 1 }

</bundles_post_ra>
